<compile_context>
chip_gen: v6e
topology: v6e:2x2x1
jax: 0.10.0
libtpu: 0.0.40
codegen_flags: <defaults>
</compile_context>

<pallas_src>
import functools
import math

import jax
import jax.numpy as jnp
from jax.experimental import pallas as pl
from jax.experimental.pallas import tpu as pltpu

BN_EPS = 1e-5


# ---------------------------------------------------------------------------
# Pallas kernel: fused dilated Conv1d (+bias) -> ReLU -> eval BatchNorm1d
# ---------------------------------------------------------------------------
def _tdnn_fused_kernel(x_ref, w_ref, b_ref, scale_ref, shift_ref, o_ref, *,
                       k_size, dilation, pad, time_tile, n_time_tiles):
    """One grid step = one batch row x one output time tile.

    x_ref:     (Cin, T_in_pad)   full reflect+zero padded row for this batch
    w_ref:     (K, Cout, Cin)    per-tap weights (bf16)
    b_ref:     (Cout, 1)         conv bias (f32)
    scale_ref: (Cout, 1)         gamma / sqrt(running_var + eps)
    shift_ref: (Cout, 1)         beta - running_mean * scale
    o_ref:     (Cout, time_tile) output tile, lane-dense
    """
    # Input window for this output tile: tile + dilation*(K-1) halo.
    if n_time_tiles == 1:
        win = x_ref[...]                                     # fully static
    else:
        base = pl.multiple_of(pl.program_id(1) * time_tile, time_tile)
        win = x_ref[:, pl.ds(base, time_tile + 2 * pad)]

    # K accumulating MXU matmuls of depth Cin (no K*Cin-tall im2col copy).
    acc = jnp.dot(w_ref[0], win[:, :time_tile],
                  preferred_element_type=jnp.float32)        # (Cout, TT) f32
    for j in range(1, k_size):                               # static unroll
        tap = win[:, j * dilation:j * dilation + time_tile]
        acc = acc + jnp.dot(w_ref[j], tap, preferred_element_type=jnp.float32)

    # f32 epilogue: conv bias (before ReLU) -> ReLU -> folded eval BatchNorm.
    acc = acc + b_ref[...]
    acc = jnp.maximum(acc, 0.0)
    acc = acc * scale_ref[...] + shift_ref[...]
    o_ref[...] = acc.astype(o_ref.dtype)        # Dropout1d(p=0.0) == identity


# ---------------------------------------------------------------------------
# Wrappers
# ---------------------------------------------------------------------------
def prepare_tdnn_params(conv_w, conv_b, bn_gamma, bn_beta, bn_mean, bn_var,
                        eps=BN_EPS, compute_dtype=jnp.bfloat16):
    """One-time parameter folding / layout. Call OUTSIDE the jitted forward."""
    cout, cin, k = conv_w.shape
    # (Cout, Cin, K) -> (K, Cout, Cin): w[j] is the j-th tap's (Cout, Cin).
    w_taps = jnp.transpose(conv_w, (2, 0, 1)).astype(compute_dtype)
    scale = bn_gamma / jnp.sqrt(bn_var + eps)
    shift = bn_beta - bn_mean * scale
    return {
        "w": w_taps,
        "b": conv_b.reshape(cout, 1).astype(jnp.float32),
        "scale": scale.reshape(cout, 1).astype(jnp.float32),
        "shift": shift.reshape(cout, 1).astype(jnp.float32),
    }


def _default_time_tile(t_len):
    # Short sequences: single tile (block == full dim, no 128-alignment
    # requirement).  Long sequences: 512 lanes keeps the MXU N-dim wide on
    # v6e/v7x, is a 128-multiple for v5e, and bounds per-step VMEM for v7x.
    if t_len <= 1024:
        return t_len
    return 512


def tdnn_block_forward(x, params, *, kernel_size, dilation, time_tile=None,
                       compute_dtype=jnp.bfloat16):
    """TDNNBlock forward (inference semantics). x: (B, Cin, T) -> (B, Cout, T)."""
    B, cin, T = x.shape
    k, cout, cin_w = params["w"].shape
    assert k == kernel_size and cin_w == cin, (params["w"].shape, kernel_size, cin)
    assert kernel_size % 2 == 1, "padding='same' requires an odd kernel_size"
    pad = dilation * (kernel_size - 1) // 2   # get_padding_elem, stride=1, odd k
    if pad >= T:
        raise ValueError("reflect padding requires dilation*(kernel_size-1)//2 < T")

    if time_tile is None:
        time_tile = _default_time_tile(T)
    if time_tile >= T:
        time_tile, n_t = T, 1
    else:
        if time_tile % 128 != 0:
            raise ValueError("time_tile must be a multiple of 128 when < T")
        n_t = pl.cdiv(T, time_tile)
    t_out = n_t * time_tile            # tile-aligned output length
    t_in = t_out + 2 * pad             # padded input row length per batch elem

    # Reflect halo (and zero tail up to the tile grid) built once here, not in
    # the hot loop.  The zero tail only feeds output columns >= T (sliced off).
    xp = jnp.pad(x, ((0, 0), (0, 0), (pad, pad)), mode="reflect") if pad else x
    if t_in > T + 2 * pad:
        xp = jnp.pad(xp, ((0, 0), (0, 0), (0, t_in - (T + 2 * pad))))
    xp = xp.astype(compute_dtype)      # bf16 matmul operands

    # Explicit VMEM budget (double-buffered input row + output tile, weights,
    # f32 accumulator) with headroom; avoids silent window shrinking / OOM.
    itm = jnp.dtype(compute_dtype).itemsize
    need = (2 * cin * t_in * itm
            + 2 * cout * time_tile * x.dtype.itemsize
            + 2 * k * cout * cin * itm
            + cout * time_tile * 4
            + 3 * cout * 4 + (1 << 20))
    vmem_limit = int(min(max(need * 3 // 2, 32 << 20), 100 << 20))

    kern = functools.partial(
        _tdnn_fused_kernel, k_size=kernel_size, dilation=dilation, pad=pad,
        time_tile=time_tile, n_time_tiles=n_t)

    out = pl.pallas_call(
        kern,
        out_shape=jax.ShapeDtypeStruct((B, cout, t_out), x.dtype),
        grid=(B, n_t),
        in_specs=[
            # Full padded time row per batch element; its block index is
            # constant along the time-tile axis, so it is DMA'd once per batch
            # row and the dilation halo needs no special per-tile handling.
            pl.BlockSpec((None, cin, t_in), lambda b, t: (b, 0, 0)),
            pl.BlockSpec((k, cout, cin), lambda b, t: (0, 0, 0)),
            pl.BlockSpec((cout, 1), lambda b, t: (0, 0)),
            pl.BlockSpec((cout, 1), lambda b, t: (0, 0)),
            pl.BlockSpec((cout, 1), lambda b, t: (0, 0)),
        ],
        # Direct (B, Cout, T) layout: lane-dense (Cout, TT) stores, no
        # post-call reshape/transpose HBM round-trip.
        out_specs=pl.BlockSpec((None, cout, time_tile), lambda b, t: (b, 0, t)),
        compiler_params=pltpu.CompilerParams(
            dimension_semantics=("parallel", "arbitrary"),
            vmem_limit_bytes=vmem_limit),
    )(xp, params["w"], params["b"], params["scale"], params["shift"])

    return out[:, :, :T] if t_out != T else out


# ---------------------------------------------------------------------------
# Pure-JAX reference (matches the PyTorch TDNNBlock, eval mode)
# ---------------------------------------------------------------------------
def tdnn_block_reference(x, conv_w, conv_b, bn_gamma, bn_beta, bn_mean, bn_var,
                         *, dilation, eps=BN_EPS):
    B, cin, T = x.shape
    cout, _, k = conv_w.shape
    pad = dilation * (k - 1) // 2
    xp = jnp.pad(x, ((0, 0), (0, 0), (pad, pad)), mode="reflect") if pad else x
    out = jnp.zeros((B, cout, T), jnp.float32)
    for j in range(k):
        out = out + jnp.einsum("oc,bct->bot", conv_w[:, :, j],
                               xp[:, :, j * dilation:j * dilation + T])
    out = out + conv_b[None, :, None]
    out = jnp.maximum(out, 0.0)
    scale = bn_gamma / jnp.sqrt(bn_var + eps)
    shift = bn_beta - bn_mean * scale
    return out * scale[None, :, None] + shift[None, :, None]


if __name__ == "__main__":
    def make_case(key, B, CIN, COUT, T, K):
        ks = jax.random.split(key, 7)
        x = jax.random.normal(ks[0], (B, CIN, T), jnp.float32)
        conv_w = jax.random.normal(ks[1], (COUT, CIN, K), jnp.float32) / math.sqrt(CIN * K)
        conv_b = 0.01 * jax.random.normal(ks[2], (COUT,), jnp.float32)
        gamma = 1.0 + 0.1 * jax.random.normal(ks[3], (COUT,), jnp.float32)
        beta = 0.1 * jax.random.normal(ks[4], (COUT,), jnp.float32)
        mean = 0.1 * jax.random.normal(ks[5], (COUT,), jnp.float32)
        var = 1.0 + 0.1 * jnp.abs(jax.random.normal(ks[6], (COUT,), jnp.float32))
        return x, conv_w, conv_b, gamma, beta, mean, var

    k0, k1 = jax.random.split(jax.random.PRNGKey(0))

    # Case 1: small shapes consistent with the module (single-time-tile path).
    B, CIN, COUT, T, K, DIL = 2, 16, 16, 16, 3, 2
    x, cw, cb, g, be, mu, vr = make_case(k0, B, CIN, COUT, T, K)
    params = prepare_tdnn_params(cw, cb, g, be, mu, vr)      # folded once
    fwd = jax.jit(functools.partial(tdnn_block_forward,
                                    kernel_size=K, dilation=DIL))
    out = fwd(x, params)
    jax.block_until_ready(out)
    ref = tdnn_block_reference(x, cw, cb, g, be, mu, vr, dilation=DIL)
    assert out.shape == (B, COUT, T), out.shape
    assert bool(jnp.all(jnp.isfinite(out)))
    err1 = float(jnp.max(jnp.abs(out - ref)))
    assert err1 < 5e-2, err1   # bf16 matmul operands, f32 accumulation

    # Case 2: exercises the multi-time-tile path (128-lane tiles + zero tail).
    B, CIN, COUT, T, K, DIL = 2, 8, 16, 250, 3, 3
    x, cw, cb, g, be, mu, vr = make_case(k1, B, CIN, COUT, T, K)
    params = prepare_tdnn_params(cw, cb, g, be, mu, vr)
    fwd = jax.jit(functools.partial(tdnn_block_forward, kernel_size=K,
                                    dilation=DIL, time_tile=128))
    out = fwd(x, params)
    jax.block_until_ready(out)
    ref = tdnn_block_reference(x, cw, cb, g, be, mu, vr, dilation=DIL)
    assert out.shape == (B, COUT, T), out.shape
    assert bool(jnp.all(jnp.isfinite(out)))
    err2 = float(jnp.max(jnp.abs(out - ref)))
    assert err2 < 5e-2, err2

    print("KERNEL_OK")
</pallas_src>

<mosaic_0001>
module attributes {stable_mosaic.version = 11 : i64} {
  func.func @_tdnn_fused_kernel(%arg0: i32, %arg1: i32, %arg2: memref<1x16x20xbf16, #tpu.memory_space<vmem>>, %arg3: memref<3x16x16xbf16, #tpu.memory_space<vmem>>, %arg4: memref<16x1xf32, #tpu.memory_space<vmem>>, %arg5: memref<16x1xf32, #tpu.memory_space<vmem>>, %arg6: memref<16x1xf32, #tpu.memory_space<vmem>>, %arg7: memref<1x16x16xf32, #tpu.memory_space<vmem>>) attributes {dimension_semantics = [#tpu.dimension_semantics<parallel>, #tpu.dimension_semantics<arbitrary>], iteration_bounds = array<i64: 2, 1>, scalar_prefetch = 0 : i64, scratch_operands = 0 : i64, tpu.core_type = #tpu.core_type<tc>, window_params = [{transform_indices = @transform_0, window_bounds = array<i64: 1, 16, 20>}, {pipeline_mode = #tpu.pipeline_mode<synchronous>, transform_indices = @transform_1, window_bounds = array<i64: 3, 16, 16>}, {pipeline_mode = #tpu.pipeline_mode<synchronous>, transform_indices = @transform_2, window_bounds = array<i64: 16, 1>}, {pipeline_mode = #tpu.pipeline_mode<synchronous>, transform_indices = @transform_3, window_bounds = array<i64: 16, 1>}, {pipeline_mode = #tpu.pipeline_mode<synchronous>, transform_indices = @transform_4, window_bounds = array<i64: 16, 1>}, {transform_indices = @transform_5, window_bounds = array<i64: 1, 16, 16>}]} {
    %c0 = arith.constant 0 : index
    %c0_0 = arith.constant 0 : index
    %c0_1 = arith.constant 0 : index
    %0 = vector.load %arg2[%c0, %c0_0, %c0_1] : memref<1x16x20xbf16, #tpu.memory_space<vmem>>, vector<1x16x20xbf16>
    %1 = vector.shape_cast %0 : vector<1x16x20xbf16> to vector<16x20xbf16>
    %c0_2 = arith.constant 0 : index
    %c0_3 = arith.constant 0 : index
    %c0_4 = arith.constant 0 : index
    %2 = vector.load %arg3[%c0_2, %c0_3, %c0_4] : memref<3x16x16xbf16, #tpu.memory_space<vmem>>, vector<1x16x16xbf16>
    %3 = vector.shape_cast %2 : vector<1x16x16xbf16> to vector<16x16xbf16>
    %4 = vector.extract_strided_slice %1 {offsets = [0, 0], sizes = [16, 16], strides = [1, 1]} : vector<16x20xbf16> to vector<16x16xbf16>
    %cst = arith.constant dense<0.000000e+00> : vector<16x16xf32>
    %5 = tpu.matmul %3, %4, %cst {dimension_numbers = #tpu.dot_dimension_numbers<[1], [0], [0], [1], [0, 0, 1, 1], [], []>} : vector<16x16xbf16>, vector<16x16xbf16>, vector<16x16xf32> -> vector<16x16xf32>
    %6 = vector.extract_strided_slice %1 {offsets = [0, 2], sizes = [16, 16], strides = [1, 1]} : vector<16x20xbf16> to vector<16x16xbf16>
    %c1 = arith.constant 1 : index
    %c0_5 = arith.constant 0 : index
    %c0_6 = arith.constant 0 : index
    %7 = vector.load %arg3[%c1, %c0_5, %c0_6] : memref<3x16x16xbf16, #tpu.memory_space<vmem>>, vector<1x16x16xbf16>
    %8 = vector.shape_cast %7 : vector<1x16x16xbf16> to vector<16x16xbf16>
    %cst_7 = arith.constant dense<0.000000e+00> : vector<16x16xf32>
    %9 = tpu.matmul %8, %6, %cst_7 {dimension_numbers = #tpu.dot_dimension_numbers<[1], [0], [0], [1], [0, 0, 1, 1], [], []>} : vector<16x16xbf16>, vector<16x16xbf16>, vector<16x16xf32> -> vector<16x16xf32>
    %10 = arith.addf %5, %9 : vector<16x16xf32>
    %11 = vector.extract_strided_slice %1 {offsets = [0, 4], sizes = [16, 16], strides = [1, 1]} : vector<16x20xbf16> to vector<16x16xbf16>
    %c2 = arith.constant 2 : index
    %c0_8 = arith.constant 0 : index
    %c0_9 = arith.constant 0 : index
    %12 = vector.load %arg3[%c2, %c0_8, %c0_9] : memref<3x16x16xbf16, #tpu.memory_space<vmem>>, vector<1x16x16xbf16>
    %13 = vector.shape_cast %12 : vector<1x16x16xbf16> to vector<16x16xbf16>
    %cst_10 = arith.constant dense<0.000000e+00> : vector<16x16xf32>
    %14 = tpu.matmul %13, %11, %cst_10 {dimension_numbers = #tpu.dot_dimension_numbers<[1], [0], [0], [1], [0, 0, 1, 1], [], []>} : vector<16x16xbf16>, vector<16x16xbf16>, vector<16x16xf32> -> vector<16x16xf32>
    %15 = arith.addf %10, %14 : vector<16x16xf32>
    %c0_11 = arith.constant 0 : index
    %c0_12 = arith.constant 0 : index
    %16 = vector.load %arg4[%c0_11, %c0_12] : memref<16x1xf32, #tpu.memory_space<vmem>>, vector<16x1xf32>
    %17 = vector.broadcast %16 : vector<16x1xf32> to vector<16x16xf32>
    %18 = arith.addf %15, %17 : vector<16x16xf32>
    %cst_13 = arith.constant 0.000000e+00 : f32
    %19 = vector.broadcast %cst_13 : f32 to vector<16x16xf32>
    %20 = arith.maximumf %18, %19 : vector<16x16xf32>
    %c0_14 = arith.constant 0 : index
    %c0_15 = arith.constant 0 : index
    %21 = vector.load %arg5[%c0_14, %c0_15] : memref<16x1xf32, #tpu.memory_space<vmem>>, vector<16x1xf32>
    %22 = vector.broadcast %21 : vector<16x1xf32> to vector<16x16xf32>
    %23 = arith.mulf %20, %22 : vector<16x16xf32>
    %c0_16 = arith.constant 0 : index
    %c0_17 = arith.constant 0 : index
    %24 = vector.load %arg6[%c0_16, %c0_17] : memref<16x1xf32, #tpu.memory_space<vmem>>, vector<16x1xf32>
    %25 = vector.broadcast %24 : vector<16x1xf32> to vector<16x16xf32>
    %26 = arith.addf %23, %25 : vector<16x16xf32>
    %c0_18 = arith.constant 0 : index
    %c0_19 = arith.constant 0 : index
    %c0_20 = arith.constant 0 : index
    %27 = vector.load %arg7[%c0_18, %c0_19, %c0_20] : memref<1x16x16xf32, #tpu.memory_space<vmem>>, vector<1x16x16xf32>
    %28 = vector.shape_cast %27 : vector<1x16x16xf32> to vector<16x16xf32>
    %29 = vector.shape_cast %26 : vector<16x16xf32> to vector<1x16x16xf32>
    tpu.vector_store %arg7[%c0_18, %c0_19, %c0_20], %29 {strides = array<i32>} : memref<1x16x16xf32, #tpu.memory_space<vmem>>, vector<1x16x16xf32>,
    return
  }
  func.func @transform_0(%arg0: i32, %arg1: i32) -> (i32, i32, i32) {
    %c0_i32 = arith.constant 0 : i32
    %c0_i32_0 = arith.constant 0 : i32
    %c0_i32_1 = arith.constant 0 : i32
    return %arg0, %c0_i32, %c0_i32_0 : i32, i32, i32
  }
  func.func @transform_1(%arg0: i32, %arg1: i32) -> (i32, i32, i32) {
    %c0_i32 = arith.constant 0 : i32
    %c0_i32_0 = arith.constant 0 : i32
    %c0_i32_1 = arith.constant 0 : i32
    %c0_i32_2 = arith.constant 0 : i32
    return %c0_i32, %c0_i32_0, %c0_i32_1 : i32, i32, i32
  }
  func.func @transform_2(%arg0: i32, %arg1: i32) -> (i32, i32) {
    %c0_i32 = arith.constant 0 : i32
    %c0_i32_0 = arith.constant 0 : i32
    %c0_i32_1 = arith.constant 0 : i32
    return %c0_i32, %c0_i32_0 : i32, i32
  }
  func.func @transform_3(%arg0: i32, %arg1: i32) -> (i32, i32) {
    %c0_i32 = arith.constant 0 : i32
    %c0_i32_0 = arith.constant 0 : i32
    %c0_i32_1 = arith.constant 0 : i32
    return %c0_i32, %c0_i32_0 : i32, i32
  }
  func.func @transform_4(%arg0: i32, %arg1: i32) -> (i32, i32) {
    %c0_i32 = arith.constant 0 : i32
    %c0_i32_0 = arith.constant 0 : i32
    %c0_i32_1 = arith.constant 0 : i32
    return %c0_i32, %c0_i32_0 : i32, i32
  }
  func.func @transform_5(%arg0: i32, %arg1: i32) -> (i32, i32, i32) {
    %c0_i32 = arith.constant 0 : i32
    %c0_i32_0 = arith.constant 0 : i32
    return %arg0, %c0_i32, %arg1 : i32, i32, i32
  }
}

</mosaic_0001>

<bundles_post_ra>
// kernel: tdnn_block_forward.1
= control target key start
LH: loop header
LB: loop body
LE: loop exit
PB: predicated region body
PF: predicated region fallthrough
CT: control target
= control target key end

     0   :  { %10 = vsyncpa [#allocation3], 0  ;;  %s926_s0 = inlined_call_operand.vmem [shape: bf16[2,16,20], index: 0, kind: input, shape index: {}]   ;;  %s927_s1 = inlined_call_operand.vmem [shape: bf16[3,16,16], index: 1, kind: input, shape index: {}]   ;;  %s928_s2 = inlined_call_operand.vmem [shape: f32[16,1], index: 2, kind: input, shape index: {}]   ;;  %s929_s3 = inlined_call_operand.vmem [shape: f32[16,1], index: 3, kind: input, shape index: {}]   ;;  %s930_s4 = inlined_call_operand.vmem [shape: f32[16,1], index: 4, kind: input, shape index: {}]   ;;  %s931_s5 = inlined_call_operand.hbm [shape: f32[2,16,16], index: 5, kind: output, shape index: {}]  }
   0x1   :  { %12 = vsyncpa [#allocation3 + $0x1], 0  ;;  %s777_s18 = smov 0   ;;  %s779_s19 = smov 0  }
   0x2   :  { %s781_s20 = smov 0   ;;  %s783_s21 = smov 0  }
   0x3   :  { %s785_s22 = smov 0   ;;  %s787_s23 = smov 0  }
   0x4 LB: > { %s543_s24 = sadd.s32 4294967295, %s737_s23   ;;  %s544_s25 = sadd.s32 4294967294, %s737_s23   ;;  %s737_s23 = sphi %s787_s23, %s18_s23   ;;  %s733_s22 = sphi %s785_s22, %s938_s22   ;;  %s729_s21 = sphi %s783_s21, %s937_s21   ;;  %s725_s20 = sphi %s781_s20, %s936_s20   ;;  %s721_s19 = sphi %s779_s19, %s935_s19   ;;  %s717_s18 = sphi %s777_s18, %s934_s18  }
   0x5   : > { %s30_s26 = sadd.s32 1, %s733_s22  ;;  %s149_s27 = sadd.s32 1, %s725_s20 }
   0x6   : > { %p32_p0 = scmp.ge.s32.totalorder %s30_s26, 2  ;;  %p159_p1 = scmp.ne.s32.totalorder %s725_s20, %s721_s19 }
   0x7   : > { %p160_p2 = scmp.eq.s32.totalorder %s543_s24, 1  ;;  %p165_p3 = scmp.ne.s32.totalorder %s721_s19, %s717_s18 }
   0x8   : > { %s940_s26 = smov (%p32_p0, %s30_s26), 0  ;;  %p166_p5 = scmp.eq.s32.totalorder %s544_s25, 1 }
   0x9   : > { %p817_p4 = por %p160_p2, %p159_p1  ;;  %s144_s29 = ssub.s32 %s733_s22, %s940_s26 }
   0xa   : > { %p547_p6 = scmp.ge.s32.totalorder %s737_s23, 1  ;;  %p147_p7 = scmp.eq.s32.totalorder %s144_s29, 0 }
   0xb   : > { %p824_p8 = por %p166_p5, %p165_p3  ;;  %p204_p9 = scmp.lt.s32.totalorder %s737_s23, 3 }
   0xc   : > { %s830_s6 = scalar_select %p147_p7, %s725_s20, %s149_s27  }
   0xd   : > { %p205_p10 = pnand %p547_p6, %p204_p9 }
   0xe   : > { %p232_p11 = scmp.lt.s32.totalorder (!%p205_p10), %s729_s21, 1  ;;  %s742_s16 = smov (!%p205_p10), 126  }
   0xf   : > { %208 = sbr.rel (%p205_p10) target bundleno = 372 (0x174), region = 40  ;;  %s743_s25 = smov (!%p205_p10), 124  }
  0x10   : > { %s229_s17 = sand.u32 (!%p205_p10), 1, %s721_s19   ;;  %s568_s29 = sshll.u32 (!%p205_p10), %s729_s21, 8 }
  0x11   : > { %s548_s24 = sshll.u32 (!%p205_p10), %s229_s17, 4  ;;  %s876_s9 = scalar_lea.hbm (!%p205_p10), %s931_s5, %s568_s29 }
  0x12   : > { %s881_s10 = scalar_lea.sflag (!%p205_p10), [#allocation3], %s229_s17 }
  0x14   : > { %v739_v0 = vmov 0.0   ;;  %s233_s7 = scalar_select %p232_p11, %s729_s21, 1  ;;  %vm740_vm0 = vmmov 0   ;;  %v659_v2 = vld [vmem:[%s927_s1] sm:$0xff]   ;;  %v741_v3 = vmov 0   ;;  %vm258_vm1 = vcmask 130048  }
  0x15   : > { %575 = vmatprep.subr.bf16.mxu0 %v739_v0  ;;  %581 = vmatprep.subr.bf16.mxu1 %v739_v0  ;;  %v410_v4 = vld [vmem:[%s928_s2] sm:$0xff]  ;;  %v411_v5 = vld [vmem:[%s928_s2 + $0x8] sm:$0xff]  ;;  %v660_v13 = vld [vmem:[%s927_s1 + $0x10] sm:$0xff]  }
  0x16   : > { %577 = vmatprep.mubr.msk.bf16.mxu0 %vm740_vm0, %v739_v0  ;;  %583 = vmatprep.mubr.msk.bf16.mxu1 %vm740_vm0, %v739_v0  ;;  %s567_s8 = sshll.u32 %s233_s7, 3  ;;  %v426_v6 = vld [vmem:[%s929_s3] sm:$0xff]  ;;  %v427_v7 = vld [vmem:[%s929_s3 + $0x8] sm:$0xff] }
  0x17   : > { %s236_s11 = scalar_lea.vmem %s926_s0, %s567_s8  ;;  %655 = vset.pattern.permute.xlu1 %v741_v3  ;;  %656 = vset.pattern.permute.xlu0 %v741_v3  ;;  %v441_v8 = vld [vmem:[%s930_s4 + $0x8] sm:$0xff]  ;;  %v440_v9 = vld [vmem:[%s930_s4] sm:$0xff] }
  0x18   : > { %v657_v1 = vld [vmem:[%s236_s11] sm:$0xff]   ;;  %414 = vperm.xlu1 %655, %v410_v4   ;;  %v658_v11 = vld [vmem:[%s927_s1 + $0x8] sm:$0xff]   ;;  %s744_s11 = smov [#allocation2]  }
  0x19   : > { %255 = vrot.lane.b32.xlu0 %v657_v1, %s742_s16  ;;  %582 = vmatpush3.bf16.msra.mxu1 %v657_v1  ;;  %s665_s12 = sshll.u32 %s744_s11, 4  ;;  %s666_s12 = int_to_ptr.vmem [resolvable:$false] %s665_s12 }
  0x1a   : > { %s667_s13 = scalar_lea.vmem %s666_s12, 512 }
  0x1c   : > { %584 = vmatmul.mubr.msk.bf16.vlgmr.msra.gmra.mxu1 %vm258_vm1, %v659_v2  ;;  %419 = vperm.xlu1 %655, %v411_v5  }
  0x1d   : > { %361 = vrot.lane.b32.xlu0 %v657_v1, %s743_s25  ;;  %s231_s25 = scalar_lea.vmem [#allocation2], %s548_s24 }
  0x1e   : > { %s471_s27 = sshll.u32 %s231_s25, 4  ;;  %s878_s27 = int_to_ptr.vmem [resolvable:$true] %s471_s27 }
  0x1f   : > { %s661_s21 = scalar_lea.vmem %s878_s27, 256  ;;  %p668_p1 = scmp.lt.s32.totalorder %s878_s27, %s666_s12 }
  0x20   : > { %435 = vperm.xlu1 %655, %v427_v7   ;;  %p662_p12 = scmp.ne.s32.totalorder %s878_s27, %s661_s21  ;;  %p669_p2 = scmp.lt.s32.totalorder %s667_s13, %s661_s21 }
  0x21   : > { %430 = vperm.xlu0 %656, %v426_v6  }
  0x22   : > { %p663_p13 = pnand %p662_p12, %p817_p4  ;;  %p670_p3 = por %p669_p2, %p668_p1 }
  0x24   : > { %444 = vperm.xlu1 %655, %v440_v9   ;;  %p664_p0 = pneg %p663_p13 }
  0x25   : > { %449 = vperm.xlu0 %656, %v441_v8  }
  0x26   : > { %p671_p5 = pnand %p670_p3, %p664_p0 }
  0x8b   : > { %v256_v10 = vpop.permute.xlu0 %255 }
  0x8c   : > { %576 = vmatpush3.bf16.msra.mxu0 %v256_v10 }
  0x8d   : > { %587 = vmatprep.subr.bf16.mxu0 %v739_v0 }
  0x8f   : > { %578 = vmatmul.mubr.msk.bf16.vlgmr.msra.gmra.mxu0 %vm258_vm1, %v658_v11  ;;  %v362_v12 = vpop.permute.xlu0 %361 }
  0x90   : > { %588 = vmatpush3.bf16.msra.mxu0 %v362_v12  ;;  %589 = vmatprep.mubr.msk.bf16.mxu0 %vm740_vm0, %v739_v0 }
  0x93   : > { %v415_v18 = vpop.permute.xlu1 %414 }
  0x97   : > { %590 = vmatmul.mubr.msk.bf16.vlgmr.msra.gmra.mxu0 %vm258_vm1, %v660_v13  ;;  %v420_v21 = vpop.permute.xlu1 %419 }
  0x9b   : > { %v436_v27 = vpop.permute.xlu1 %435 }
  0x9c   : > { %v431_v34 = vpop.permute.xlu0 %430 }
  0x9f   : > { %v445_v38 = vpop.permute.xlu1 %444 }
  0xa0   : > { %v450_v42 = vpop.permute.xlu0 %449 }
  0xdc   : > { %v346_v14 = vpop.f32.mrf.mxu1 }
  0xde   : > { %v585_v15 = vpop.f32.mrf.mxu1 }
  0xe0   : > { %v349_v16 = vpop.f32.mrf.mxu1 }
  0xe2   : > { %v586_v17 = vpop.f32.mrf.mxu1 }
 0x14f   : > { %v296_v19 = vpop.f32.mrf.mxu0 }
 0x150   : > { %v347_v24 = vadd.f32 %v346_v14, %v296_v19 }
 0x151   : > { %v579_v20 = vpop.f32.mrf.mxu0 }
 0x153   : > { %v299_v22 = vpop.f32.mrf.mxu0 }
 0x154   : > { %v350_v29 = vadd.f32 %v349_v16, %v299_v22 }
 0x155   : > { %v580_v23 = vpop.f32.mrf.mxu0 }
 0x157   : > { %v401_v25 = vpop.f32.mrf.mxu0 }
 0x158   : > { %v408_v26 = vadd.f32 %v401_v25, %v347_v24 }
 0x159   : > { %v591_v28 = vpop.f32.mrf.mxu0 }
 0x15a   : > { %v422_v30 = vadd.f32 %v415_v18, %v408_v26 }
 0x15b   : > { %v404_v31 = vpop.f32.mrf.mxu0 }
 0x15c   : > { %v409_v32 = vadd.f32 %v404_v31, %v350_v29  ;;  %v424_v33 = vmax.f32 %v422_v30, 0.0 }
 0x15d   : > { %v592_v35 = vpop.f32.mrf.mxu0 }
 0x15e   : > { %v423_v36 = vadd.f32 %v420_v21, %v409_v32  ;;  %v438_v37 = vmul.f32 %v431_v34, %v424_v33 }
 0x160   : > { %v425_v39 = vmax.f32 %v423_v36, 0.0  ;;  %v452_v40 = vadd.f32 %v445_v38, %v438_v37 }
 0x162   : > { %454 = vst.msk [vmem:[%s231_s25] sm:$0xff] %vm258_vm1, %v452_v40  ;;  %v439_v41 = vmul.f32 %v436_v27, %v425_v39 }
 0x164   : > { %v453_v43 = vadd.f32 %v450_v42, %v439_v41 }
 0x166   : > { %455 = vst.msk [vmem:[%s231_s25 + $0x8] sm:$0xff] %vm258_vm1, %v453_v43 }
 0x167   : > { %674 = shalt.err (!%p671_p5)
}
 0x168   : > { %s675_s14 = scalar_lea.hbm %s876_s9, 256  ;;  %s679_s17 = scalar_lea.hbm %s931_s5, 512 }
 0x169   : > { %p676_p6 = scmp.ne.s32.totalorder %s876_s9, %s675_s14  ;;  %p680_p10 = scmp.lt.s32.totalorder %s876_s9, %s931_s5 }
 0x16a   : > { %p681_p11 = scmp.lt.s32.totalorder %s679_s17, %s675_s14 }
 0x16b   : > { %p677_p7 = pnand %p676_p6, %p817_p4 }
 0x16c   : > { %p682_p12 = por %p681_p11, %p680_p10 }
 0x16d   : > { %p678_p9 = pneg %p677_p7 }
 0x16f   : > { %p683_p13 = pnand %p682_p12, %p678_p9 }
 0x171   : > { %686 = shalt.err (!%p683_p13)
}
 0x172   : > { %s745_s29 = smov 128   ;;  %s746_s7 = smov 8  }
 0x173   : > { %593 = dma.vmem_to_hbm [thread:$0]  (%p817_p4), %s878_s27, 256, %s876_s9, %s881_s10, %s745_s29, %s745_s29, %s746_s7  }
 0x174 PF: > { %p599_p0 = scmp.ge.s32.totalorder %s737_s23, 2  ;;  %s486_s8 = sand.u32 1, %s717_s18  }
 0x175   : > { %s487_s21 = scalar_lea.sflag [#allocation3], %s486_s8 }
 0x176   : > { %p596_p1 = pnand %p599_p0, %p824_p8 }
 0x178   : > { %p597_p2 = pneg %p596_p1 }
 0x17a   : > { %712 = dma.done.wait (%p597_p2), %s487_s21, 256  }
 0x17b   : > { %714 = vsyncadd (%p597_p2), %s487_s21, 4294967040  ;;  %s18_s23 = sadd.s32 1, %s737_s23   ;;  %s934_s18 = smov %s721_s19 }
 0x17c   : > { %p15_p3 = scmp.ge.s32.totalorder %s18_s23, 4   ;;  %s935_s19 = smov %s725_s20 }
 0x17d   : > { %s936_s20 = smov %s830_s6  ;;  %s937_s21 = smov %s733_s22 }
 0x17e   : > { %s938_s22 = smov %s940_s26  ;;  %17 = sbr.rel (!%p15_p3) target bundleno = 4 (0x4), region = 77 }
 0x183   :  { %492 = vsyncpa [#allocation3], 1 }
 0x184   :  { %494 = vsyncpa [#allocation3 + $0x1], 1 }

</bundles_post_ra>
